<compile_context>
chip_gen: v7x
topology: tpu7x:2x2x1
jax: 0.10.0
libtpu: 0.0.40
codegen_flags: <defaults>
</compile_context>

<pallas_src>
import functools

import jax
import jax.numpy as jnp
import numpy as np
from jax.experimental import pallas as pl
from jax.experimental.pallas import tpu as pltpu


def dyrelu_coefs_kernel(x_ref, w1_ref, b1_ref, w2_ref, b2_ref,
                        theta_ref, acc_ref, *, s_true):
    # x_ref:    (B_blk, C, TS)   native dtype (spatial tile)
    # w1_ref:   (C, Cr)          f32
    # b1_ref:   (1, Cr)          f32
    # w2_ref:   (Cr, N_pad)      f32 (zero-padded past 2k)
    # b2_ref:   (1, N_pad)       f32 (zero-padded past 2k)
    # theta_ref:(B_blk, N_pad)   f32 output (lane-dense)
    # acc_ref:  (B_blk, C, 128)  f32 VMEM scratch (per-lane partial sums)
    s = pl.program_id(1)

    @pl.when(s == 0)
    def _init():
        acc_ref[...] = jnp.zeros_like(acc_ref)

    # Per-tile accumulation: sum 128-lane chunks with plain VPU adds; keep the
    # partial sums per-lane so the cross-lane (XLU) reduce happens only once.
    bb, c, ts = x_ref.shape
    n_chunks = ts // 128  # TS is always a multiple of 128 (wrapper guarantees)
    part = x_ref[:, :, 0:128].astype(jnp.float32)
    for j in range(1, n_chunks):
        part = part + x_ref[:, :, j * 128:(j + 1) * 128].astype(jnp.float32)
    acc_ref[...] += part

    @pl.when(s == pl.num_programs(1) - 1)
    def _finalize():
        # Single cross-lane reduce + divide by the true (unpadded) spatial size.
        theta = acc_ref[...].sum(axis=-1) * (1.0 / s_true)        # (B_blk, C)
        # fc1 + ReLU
        h = jnp.dot(theta, w1_ref[...], preferred_element_type=jnp.float32)
        h = jnp.maximum(h + b1_ref[...], 0.0)                     # (B_blk, Cr)
        # fc2 + (2*sigmoid - 1); padded columns give 2*sigmoid(0)-1 == 0.
        t = jnp.dot(h, w2_ref[...], preferred_element_type=jnp.float32)
        t = t + b2_ref[...]                                       # (B_blk, N_pad)
        theta_ref[...] = 2.0 * jax.nn.sigmoid(t) - 1.0


def dyrelu_get_relu_coefs(x_nchw, w1, b1, w2, b2, *, ts=512, b_blk=8):
    """x_nchw: (B, C, H, W). Returns theta: (B, 2k) float32."""
    B, C, H, W = x_nchw.shape
    S = H * W
    Cr = w1.shape[1]
    two_k = w2.shape[1]

    x = x_nchw.reshape(B, C, S)

    # Spatial tiling (lane axis): TS is a multiple of 128; pad S with zeros
    # (zeros don't perturb the sum; we divide by the true S in the kernel).
    TS = min(ts, pl.cdiv(S, 128) * 128)
    S_pad = pl.cdiv(S, TS) * TS

    # Batch tiling for the parallel grid axis.
    B_blk = min(b_blk, B)
    B_pad = pl.cdiv(B, B_blk) * B_blk

    if (S_pad != S) or (B_pad != B):
        x = jnp.pad(x, ((0, B_pad - B), (0, 0), (0, S_pad - S)))

    # Lane-dense output: pad fc2 out-dim to a multiple of 128 with zeros.
    N_pad = pl.cdiv(two_k, 128) * 128
    w2p = jnp.pad(w2.astype(jnp.float32), ((0, 0), (0, N_pad - two_k)))
    b2p = jnp.pad(b2.astype(jnp.float32).reshape(1, two_k),
                  ((0, 0), (0, N_pad - two_k)))
    b1_2d = b1.astype(jnp.float32).reshape(1, Cr)
    w1f = w1.astype(jnp.float32)

    grid = (B_pad // B_blk, S_pad // TS)
    kernel = functools.partial(dyrelu_coefs_kernel, s_true=float(S))

    dtype_bytes = jnp.dtype(x.dtype).itemsize
    cost = pl.CostEstimate(
        flops=int(2 * B * C * S + 2 * B * C * Cr + 2 * B * Cr * two_k),
        transcendentals=int(B * two_k),
        bytes_accessed=int(B * C * S * dtype_bytes
                           + (C * Cr + Cr + Cr * two_k + two_k) * 4
                           + B * two_k * 4),
    )

    out = pl.pallas_call(
        kernel,
        out_shape=jax.ShapeDtypeStruct((B_pad, N_pad), jnp.float32),
        grid=grid,
        in_specs=[
            # activation tile: varies with both grid axes
            pl.BlockSpec((B_blk, C, TS), lambda b, s: (b, 0, s)),
            # weights/biases: constant block index -> VMEM-resident across steps
            pl.BlockSpec((C, Cr), lambda b, s: (0, 0)),
            pl.BlockSpec((1, Cr), lambda b, s: (0, 0)),
            pl.BlockSpec((Cr, N_pad), lambda b, s: (0, 0)),
            pl.BlockSpec((1, N_pad), lambda b, s: (0, 0)),
        ],
        out_specs=pl.BlockSpec((B_blk, N_pad), lambda b, s: (b, 0)),
        scratch_shapes=[pltpu.VMEM((B_blk, C, 128), jnp.float32)],
        compiler_params=pltpu.CompilerParams(
            dimension_semantics=("parallel", "arbitrary")),
        cost_estimate=cost,
    )(x, w1f, b1_2d, w2p, b2p)

    return out[:B, :two_k]


def reference_coefs(x_nchw, w1, b1, w2, b2):
    theta = jnp.mean(jnp.mean(x_nchw, axis=-1), axis=-1)     # (B, C)
    h = jnp.maximum(theta @ w1 + b1, 0.0)
    t = h @ w2 + b2
    return 2.0 * jax.nn.sigmoid(t) - 1.0


def _make_params(key, C, reduction, k):
    Cr = C // reduction
    two_k = 2 * k
    kw1, kb1, kw2, kb2 = jax.random.split(key, 4)
    # torch Linear weight is (out, in); we store the transposed (in, out)
    # layout used by the kernel's x @ W convention.
    w1 = jax.random.normal(kw1, (C, Cr), dtype=jnp.float32) * 0.5
    b1 = jax.random.normal(kb1, (Cr,), dtype=jnp.float32) * 0.1
    w2 = jax.random.normal(kw2, (Cr, two_k), dtype=jnp.float32) * 0.5
    b2 = jax.random.normal(kb2, (two_k,), dtype=jnp.float32) * 0.1
    return w1, b1, w2, b2


if __name__ == "__main__":
    key = jax.random.PRNGKey(0)

    # --- Case 1: module hyperparameters (conv_type='2d'), small shapes.
    B, C, H, W = 2, 4, 16, 16
    reduction, k = 4, 2
    k1, k2 = jax.random.split(key)
    x = jax.random.normal(k1, (B, C, H, W), dtype=jnp.float32)
    w1, b1, w2, b2 = _make_params(k2, C, reduction, k)

    # Buffers from the module (unused by get_relu_coefs; kept for fidelity).
    lambdas = jnp.array([1.0] * k + [0.5] * k, dtype=jnp.float32)
    init_v = jnp.array([1.0] + [0.0] * (2 * k - 1), dtype=jnp.float32)

    theta = jax.block_until_ready(dyrelu_get_relu_coefs(x, w1, b1, w2, b2))
    ref = reference_coefs(x, w1, b1, w2, b2)
    np.testing.assert_allclose(np.asarray(theta), np.asarray(ref),
                               rtol=1e-5, atol=1e-5)

    # --- Case 2: exercise multi-step spatial grid, ragged S and ragged batch.
    B2, C2, H2, W2 = 3, 8, 24, 24            # S = 576 -> 2 spatial tiles of 512
    k3, k4 = jax.random.split(k2)
    x2 = jax.random.normal(k3, (B2, C2, H2, W2), dtype=jnp.float32)
    w1b, b1b, w2b, b2b = _make_params(k4, C2, reduction, k)

    theta2 = jax.block_until_ready(
        dyrelu_get_relu_coefs(x2, w1b, b1b, w2b, b2b, ts=512, b_blk=2))
    ref2 = reference_coefs(x2, w1b, b1b, w2b, b2b)
    np.testing.assert_allclose(np.asarray(theta2), np.asarray(ref2),
                               rtol=1e-5, atol=1e-5)

    print("KERNEL_OK")
</pallas_src>

<mosaic_0001>
module attributes {stable_mosaic.version = 11 : i64} {
  func.func @dyrelu_coefs_kernel(%arg0: i32, %arg1: i32, %arg2: memref<2x4x256xf32, #tpu.memory_space<vmem>>, %arg3: memref<4x1xf32, #tpu.memory_space<vmem>>, %arg4: memref<1x1xf32, #tpu.memory_space<vmem>>, %arg5: memref<1x128xf32, #tpu.memory_space<vmem>>, %arg6: memref<1x128xf32, #tpu.memory_space<vmem>>, %arg7: memref<2x128xf32, #tpu.memory_space<vmem>>, %arg8: memref<2x4x128xf32, #tpu.memory_space<vmem>>) attributes {dimension_semantics = [#tpu.dimension_semantics<parallel>, #tpu.dimension_semantics<arbitrary>], iteration_bounds = array<i64: 1, 1>, scalar_prefetch = 0 : i64, scratch_operands = 1 : i64, tpu.core_type = #tpu.core_type<tc>, window_params = [{transform_indices = @transform_0, window_bounds = array<i64: 2, 4, 256>}, {pipeline_mode = #tpu.pipeline_mode<synchronous>, transform_indices = @transform_1, window_bounds = array<i64: 4, 1>}, {pipeline_mode = #tpu.pipeline_mode<synchronous>, transform_indices = @transform_2, window_bounds = array<i64: 1, 1>}, {pipeline_mode = #tpu.pipeline_mode<synchronous>, transform_indices = @transform_3, window_bounds = array<i64: 1, 128>}, {pipeline_mode = #tpu.pipeline_mode<synchronous>, transform_indices = @transform_4, window_bounds = array<i64: 1, 128>}, {transform_indices = @transform_5, window_bounds = array<i64: 2, 128>}]} {
    %c0_i32 = arith.constant 0 : i32
    %0 = arith.cmpi eq, %arg1, %c0_i32 : i32
    %1 = arith.extui %0 : i1 to i32
    %c0_i32_0 = arith.constant 0 : i32
    %2 = arith.cmpi ne, %1, %c0_i32_0 : i32
    scf.if %2 {
      %cst = arith.constant 0.000000e+00 : f32
      %12 = vector.broadcast %cst : f32 to vector<2x4x128xf32>
      %c0_13 = arith.constant 0 : index
      %c0_14 = arith.constant 0 : index
      %c0_15 = arith.constant 0 : index
      %13 = vector.load %arg8[%c0_13, %c0_14, %c0_15] : memref<2x4x128xf32, #tpu.memory_space<vmem>>, vector<2x4x128xf32>
      tpu.vector_store %arg8[%c0_13, %c0_14, %c0_15], %12 {strides = array<i32>} : memref<2x4x128xf32, #tpu.memory_space<vmem>>, vector<2x4x128xf32>,
    } else {
    }
    %c0 = arith.constant 0 : index
    %c0_1 = arith.constant 0 : index
    %c0_2 = arith.constant 0 : index
    %3 = vector.load %arg2[%c0, %c0_1, %c0_2] : memref<2x4x256xf32, #tpu.memory_space<vmem>>, vector<2x4x128xf32>
    %c0_3 = arith.constant 0 : index
    %c0_4 = arith.constant 0 : index
    %c128 = arith.constant 128 : index
    %4 = vector.load %arg2[%c0_3, %c0_4, %c128] : memref<2x4x256xf32, #tpu.memory_space<vmem>>, vector<2x4x128xf32>
    %5 = arith.addf %3, %4 : vector<2x4x128xf32>
    %c0_5 = arith.constant 0 : index
    %c0_6 = arith.constant 0 : index
    %c0_7 = arith.constant 0 : index
    %6 = vector.load %arg8[%c0_5, %c0_6, %c0_7] : memref<2x4x128xf32, #tpu.memory_space<vmem>>, vector<2x4x128xf32>
    %7 = arith.addf %6, %5 : vector<2x4x128xf32>
    %c0_8 = arith.constant 0 : index
    %c0_9 = arith.constant 0 : index
    %c0_10 = arith.constant 0 : index
    %8 = vector.load %arg8[%c0_8, %c0_9, %c0_10] : memref<2x4x128xf32, #tpu.memory_space<vmem>>, vector<2x4x128xf32>
    tpu.vector_store %arg8[%c0_8, %c0_9, %c0_10], %7 {strides = array<i32>} : memref<2x4x128xf32, #tpu.memory_space<vmem>>, vector<2x4x128xf32>,
    %c0_i32_11 = arith.constant 0 : i32
    %9 = arith.cmpi eq, %arg1, %c0_i32_11 : i32
    %10 = arith.extui %9 : i1 to i32
    %c0_i32_12 = arith.constant 0 : i32
    %11 = arith.cmpi ne, %10, %c0_i32_12 : i32
    scf.if %11 {
      %c0_13 = arith.constant 0 : index
      %c0_14 = arith.constant 0 : index
      %c0_15 = arith.constant 0 : index
      %12 = vector.load %arg8[%c0_13, %c0_14, %c0_15] : memref<2x4x128xf32, #tpu.memory_space<vmem>>, vector<2x4x128xf32>
      %cst = arith.constant dense<0.000000e+00> : vector<2x4xf32>
      %13 = vector.multi_reduction <add>, %12, %cst [2] : vector<2x4x128xf32> to vector<2x4xf32>
      %cst_16 = arith.constant 3.906250e-03 : f32
      %14 = vector.broadcast %cst_16 : f32 to vector<2x4xf32>
      %15 = arith.mulf %13, %14 : vector<2x4xf32>
      %c0_17 = arith.constant 0 : index
      %c0_18 = arith.constant 0 : index
      %16 = vector.load %arg3[%c0_17, %c0_18] : memref<4x1xf32, #tpu.memory_space<vmem>>, vector<4x1xf32>
      %cst_19 = arith.constant dense<0.000000e+00> : vector<2x1xf32>
      %17 = tpu.matmul %15, %16, %cst_19 {dimension_numbers = #tpu.dot_dimension_numbers<[1], [0], [0], [1], [0, 0, 1, 1], [], []>} : vector<2x4xf32>, vector<4x1xf32>, vector<2x1xf32> -> vector<2x1xf32>
      %c0_20 = arith.constant 0 : index
      %c0_21 = arith.constant 0 : index
      %18 = vector.load %arg4[%c0_20, %c0_21] : memref<1x1xf32, #tpu.memory_space<vmem>>, vector<1x1xf32>
      %19 = vector.broadcast %18 : vector<1x1xf32> to vector<2x1xf32>
      %20 = arith.addf %17, %19 : vector<2x1xf32>
      %cst_22 = arith.constant 0.000000e+00 : f32
      %21 = vector.broadcast %cst_22 : f32 to vector<2x1xf32>
      %22 = arith.maximumf %20, %21 : vector<2x1xf32>
      %c0_23 = arith.constant 0 : index
      %c0_24 = arith.constant 0 : index
      %23 = vector.load %arg5[%c0_23, %c0_24] : memref<1x128xf32, #tpu.memory_space<vmem>>, vector<1x128xf32>
      %cst_25 = arith.constant dense<0.000000e+00> : vector<2x128xf32>
      %24 = tpu.matmul %22, %23, %cst_25 {dimension_numbers = #tpu.dot_dimension_numbers<[1], [0], [0], [1], [0, 0, 1, 1], [], []>} : vector<2x1xf32>, vector<1x128xf32>, vector<2x128xf32> -> vector<2x128xf32>
      %c0_26 = arith.constant 0 : index
      %c0_27 = arith.constant 0 : index
      %25 = vector.load %arg6[%c0_26, %c0_27] : memref<1x128xf32, #tpu.memory_space<vmem>>, vector<1x128xf32>
      %26 = vector.broadcast %25 : vector<1x128xf32> to vector<2x128xf32>
      %27 = arith.addf %24, %26 : vector<2x128xf32>
      %28 = arith.negf %27 : vector<2x128xf32>
      %29 = math.exp %28 : vector<2x128xf32>
      %cst_28 = arith.constant 1.000000e+00 : f32
      %30 = vector.broadcast %cst_28 : f32 to vector<2x128xf32>
      %31 = arith.addf %30, %29 : vector<2x128xf32>
      %32 = arith.divf %30, %31 : vector<2x128xf32>
      %cst_29 = arith.constant 2.000000e+00 : f32
      %33 = vector.broadcast %cst_29 : f32 to vector<2x128xf32>
      %34 = arith.mulf %33, %32 : vector<2x128xf32>
      %cst_30 = arith.constant 1.000000e+00 : f32
      %35 = vector.broadcast %cst_30 : f32 to vector<2x128xf32>
      %36 = arith.subf %34, %35 : vector<2x128xf32>
      %c0_31 = arith.constant 0 : index
      %c0_32 = arith.constant 0 : index
      %37 = vector.load %arg7[%c0_31, %c0_32] : memref<2x128xf32, #tpu.memory_space<vmem>>, vector<2x128xf32>
      tpu.vector_store %arg7[%c0_31, %c0_32], %36 {strides = array<i32>} : memref<2x128xf32, #tpu.memory_space<vmem>>, vector<2x128xf32>,
    } else {
    }
    return
  }
  func.func @transform_0(%arg0: i32, %arg1: i32) -> (i32, i32, i32) {
    %c0_i32 = arith.constant 0 : i32
    %c0_i32_0 = arith.constant 0 : i32
    return %arg0, %c0_i32, %arg1 : i32, i32, i32
  }
  func.func @transform_1(%arg0: i32, %arg1: i32) -> (i32, i32) {
    %c0_i32 = arith.constant 0 : i32
    %c0_i32_0 = arith.constant 0 : i32
    %c0_i32_1 = arith.constant 0 : i32
    return %c0_i32, %c0_i32_0 : i32, i32
  }
  func.func @transform_2(%arg0: i32, %arg1: i32) -> (i32, i32) {
    %c0_i32 = arith.constant 0 : i32
    %c0_i32_0 = arith.constant 0 : i32
    %c0_i32_1 = arith.constant 0 : i32
    return %c0_i32, %c0_i32_0 : i32, i32
  }
  func.func @transform_3(%arg0: i32, %arg1: i32) -> (i32, i32) {
    %c0_i32 = arith.constant 0 : i32
    %c0_i32_0 = arith.constant 0 : i32
    %c0_i32_1 = arith.constant 0 : i32
    return %c0_i32, %c0_i32_0 : i32, i32
  }
  func.func @transform_4(%arg0: i32, %arg1: i32) -> (i32, i32) {
    %c0_i32 = arith.constant 0 : i32
    %c0_i32_0 = arith.constant 0 : i32
    %c0_i32_1 = arith.constant 0 : i32
    return %c0_i32, %c0_i32_0 : i32, i32
  }
  func.func @transform_5(%arg0: i32, %arg1: i32) -> (i32, i32) {
    %c0_i32 = arith.constant 0 : i32
    %c0_i32_0 = arith.constant 0 : i32
    return %arg0, %c0_i32 : i32, i32
  }
}

</mosaic_0001>

<bundles_post_ra>
// kernel: tpu_custom_call.1
= control target key start
LH: loop header
LB: loop body
LE: loop exit
PB: predicated region body
PF: predicated region fallthrough
CT: control target
= control target key end

     0   :  { %s430_s0 = inlined_call_operand.hbm [shape: f32[2,4,256], index: 0, kind: input, shape index: {}]   ;;  %s431_s1 = inlined_call_operand.vmem [shape: f32[4,1], index: 1, kind: input, shape index: {}]   ;;  %s432_s2 = inlined_call_operand.<no memory space> [shape: f32[1,1], index: 2, kind: input, shape index: {}]   ;;  %s433_s3 = inlined_call_operand.vmem [shape: f32[1,128], index: 3, kind: input, shape index: {}]   ;;  %s434_s4 = inlined_call_operand.vmem [shape: f32[1,128], index: 4, kind: input, shape index: {}]   ;;  %s435_s5 = inlined_call_operand.hbm [shape: f32[2,128], index: 5, kind: output, shape index: {}]  }
   0x1   :  { %v10_v0 = vstv %s432_s2 }
   0x2   :  { %11 = vst [vmem:[#allocation3] sm:$0x1] %v10_v0 }
   0x3   :  { %12 = vsyncpa [#allocation5], 0 }
   0x4   :  { %13 = vsyncpa [#allocation6], 0  ;;  %s358_s20 = smov [#allocation4]   ;;  %s310_s24 = scalar_lea.hbm %s430_s0, 256 }
   0x5   :  { %s19_s21 = sshll.u32 %s358_s20, 4  ;;  %p311_p0 = scmp.ne.s32.totalorder %s430_s0, %s310_s24  ;;  %s20_s21 = int_to_ptr.vmem [resolvable:$true] %s19_s21 }
   0x6   :  { %p314_p1 = scmp.lt.u32.totalorder %s310_s24, %s430_s0 }
   0x8   :  { %p316_p2 = pnand %p314_p1, %p311_p0 }
   0xa   :  { %319 = shalt.err (!%p316_p2)
}
   0xb   :  { %s320_s2 = scalar_lea.vmem %s20_s21, 256  ;;  %p325_p4 = scmp.lt.s32.totalorder %s20_s21, %s20_s21 }
   0xc   :  { %p321_p3 = scmp.ne.s32.totalorder %s20_s21, %s320_s2  ;;  %p326_p5 = scmp.lt.s32.totalorder %s320_s2, %s320_s2 }
   0xe   :  { %p327_p6 = por %p326_p5, %p325_p4 }
  0x10   :  { %p328_p7 = pnand %p327_p6, %p321_p3 }
  0x12   :  { %331 = shalt.err (!%p328_p7)
}
  0x13   :  { %s359_s29 = smov 128   ;;  %s360_s30 = smov 8  }
  0x14   :  { %25 = dma.hbm_to_vmem [thread:$0]  %s430_s0, 256, %s20_s21, [#allocation5], %s359_s29, %s359_s29, %s360_s30  }
  0x15   :  { %354 = dma.done.wait [#allocation5], 256  }
  0x16   :  { %355 = vsyncadd [#allocation5], 4294967040  ;;  %v361_v1 = vmov 0.0   ;;  %v43_v2 = vld [vmem:[#allocation4] sm:$0xf]  ;;  %vm60_vm0 = vcmask 1043456   ;;  %v79_v17 = vlaneseq }
  0x17   :  { %41 = vst [vmem:[#allocation2] sm:$0xf] %v361_v1  ;;  %42 = vst [vmem:[#allocation2 + $0x4] sm:$0xf] %v361_v1  ;;  %290 = vmatprep.subr.mxu0 %v361_v1  ;;  %295 = vmatprep.subr.mxu1 %v361_v1  ;;  %v45_v3 = vld [vmem:[#allocation4 + $0x4] sm:$0xf] }
  0x18   :  { %v44_v4 = vld [vmem:[#allocation4 + $0x8] sm:$0xf]  ;;  %v47_v5 = vadd.f32 %v45_v3, %v43_v2  ;;  %v46_v7 = vld [vmem:[#allocation4 + $0xc] sm:$0xf]  ;;  %v69_v16 = vld [vmem:[%s431_s1] sm:$0xf] }
  0x19   :  { %v48_v9 = vadd.f32 %v46_v7, %v44_v4  ;;  %291 = vmatpush3.msk.msra.mxu0 %vm60_vm0, %v69_v16  ;;  %vm362_vm1 = vmmov 0   ;;  %v80_v18 = vand.u32 127, %v79_v17  ;;  %v82_v19 = vshrl.u32 %v79_v17, 7  ;;  %v168_v28 = vld [vmem:[%s433_s3] sm:$0x1]  ;;  %s363_s3 = smov [#allocation7]  }
  0x1a   :  { %292 = vmatprep.mubr.msk.f32.mxu0 %vm362_vm1, %v361_v1  ;;  %297 = vmatprep.mubr.msk.f32.mxu1 %vm362_vm1, %v361_v1  ;;  %vm89_vm2 = vcmask 1041409   ;;  %vm91_vm3 = vcmask 31744   ;;  %vm180_vm4 = vcmask 1040384   ;;  %v278_v29 = vld [vmem:[#allocation3] ss:$0 sm:$0xff]  ;;  %vm176_vm5 = vcmask 7168  }
  0x1b   :  { %v83_v21 = vsub.s32 %v80_v18, %v82_v19  ;;  %296 = vmatpush3.msk.msra.mxu1 %vm180_vm4, %v168_v28  ;;  %v281_v34 = vld [vmem:[%s434_s4] ss:$0 sm:$0xff]  ;;  %s269_s12 = sshll.u32 %s363_s3, 4  ;;  %s270_s12 = int_to_ptr.vmem [resolvable:$true] %s269_s12 }
  0x1c   :  { %s332_s13 = scalar_lea.vmem %s270_s12, 32  ;;  %p337_p9 = scmp.lt.s32.totalorder %s270_s12, %s270_s12 }
  0x1d   :  { %p333_p8 = scmp.ne.s32.totalorder %s270_s12, %s332_s13  ;;  %p338_p10 = scmp.lt.s32.totalorder %s332_s13, %s332_s13 }
  0x1e   :  { %v49_v6 = vld [vmem:[#allocation2] sm:$0xf]  ;;  %v50_v8 = vld [vmem:[#allocation2 + $0x4] sm:$0xf] }
  0x1f   :  { %v51_v10 = vadd.f32 %v49_v6, %v47_v5  ;;  %v52_v11 = vadd.f32 %v50_v8, %v48_v9  ;;  %p339_p11 = por %p338_p10, %p337_p9 }
  0x21   :  { %53 = vst [vmem:[#allocation2] sm:$0xf] %v51_v10  ;;  %54 = vst [vmem:[#allocation2 + $0x4] sm:$0xf] %v52_v11  ;;  %p340_p12 = pnand %p339_p11, %p333_p8 }
  0x28   :  { %v58_v12 = vld [vmem:[#allocation2] sm:$0xf]  ;;  %v59_v14 = vld [vmem:[#allocation2 + $0x4] sm:$0xf] }
  0x29   :  { %v61_v13 = vsel %vm60_vm0, %v58_v12, 0.0  ;;  %v64_v15 = vsel %vm60_vm0, %v59_v14, 0.0 }
  0x2a   :  { %62 = vadd.xlane.f32.xlu0 %v61_v13 }
  0x2e   :  { %65 = vadd.xlane.f32.xlu0 %v64_v15 }
  0xb7   :  { %v63_v20 = vpop.xlane.xlu0 %62 }
  0xb8   :  { %v67_v22 = vmul.f32 0.00390625, %v63_v20 }
  0xba   :  { %v84_v25 = vrot.slane %v67_v22, %v83_v21 }
  0xbb   :  { %v66_v23 = vpop.xlane.xlu0 %65 }
  0xbc   :  { %v68_v24 = vmul.f32 0.00390625, %v66_v23 }
  0xbe   :  { %v88_v26 = vrot.slane %v68_v24, %v83_v21 }
  0xc0   :  { %v90_v27 = vsel %vm89_vm2, %v88_v26, %v84_v25 }
  0xc1   :  { %293 = vmatmul.mubr.msk.f32.vlgmr.msra.gmra.mrb[0].mxu0 %vm91_vm3, %v90_v27 }
 0x194   :  { %v163_v30 = vpop.f32.mrb[0].mxu0 }
 0x195   :  { %v164_v31 = vadd.f32 %v278_v29, %v163_v30  ;;  %v294_v32 = vpop.f32.mrb[1].mxu0 }
 0x197   :  { %v167_v33 = vmax.f32 %v164_v31, 0.0 }
 0x199   :  { %298 = vmatmul.mubr.msk.f32.vlgmr.msra.gmra.mrb[0].mxu1 %vm176_vm5, %v167_v33 }
 0x26c   :  { %v250_v35 = vpop.f32.mrb[0].mxu1 }
 0x26d   :  { %v251_v36 = vadd.f32 %v281_v34, %v250_v35  ;;  %v299_v37 = vpop.f32.mrb[1].mxu1 }
 0x26f   :  { %v284_v38 = vmul.f32 -1.442695, %v251_v36 }
 0x271   :  { %306 = vpow2.f32 %v284_v38 }
 0x27b   :  { %v307_v39 = vpop.eup %306 }
 0x27c   :  { %v257_v40 = vadd.f32 1.0, %v307_v39 }
 0x27e   :  { %308 = vrcp.f32 %v257_v40 }
 0x288   :  { %v309_v41 = vpop.eup %308 }
 0x289   :  { %v260_v42 = vmul.f32 2.0, %v309_v41 }
 0x28b   :  { %v285_v43 = vadd.f32 -1.0, %v260_v42 }
 0x28d   :  { %262 = vst [vmem:[#allocation7] sm:$0x3] %v285_v43 }
 0x28e   :  { %343 = shalt.err (!%p340_p12)
}
 0x28f   :  { %s344_s15 = scalar_lea.hbm %s435_s5, 32 }
 0x290   :  { %p345_p13 = scmp.ne.s32.totalorder %s435_s5, %s344_s15  ;;  %p348_p0 = scmp.lt.u32.totalorder %s344_s15, %s435_s5 }
 0x292   :  { %p350_p1 = pnand %p348_p0, %p345_p13 }
 0x294   :  { %353 = shalt.err (!%p350_p1)
}
 0x295   :  { %272 = dma.vmem_to_hbm [thread:$0]  %s270_s12, 32, %s435_s5, [#allocation6]  }
 0x296   :  { %356 = dma.done.wait [#allocation6], 32  }
 0x297   :  { %357 = vsyncadd [#allocation6], 4294967264 }
 0x298   :  { %276 = vsyncpa [#allocation5], 1 }
 0x299   :  { %277 = vsyncpa [#allocation6], 1 }

</bundles_post_ra>
